<compile_context>
chip_gen: v6e
topology: v6e:2x2x1
jax: 0.10.0
libtpu: 0.0.40
codegen_flags: <defaults>
</compile_context>

<pallas_src>
import functools

import jax
import jax.numpy as jnp
from jax.experimental import pallas as pl
from jax.experimental.pallas import tpu as pltpu

LEAKY_SLOPE = 0.2
BN_EPS = 1e-5
_BF16_SUBLANES = 16                      # bf16 sublane tile (rows per vreg tile)
_VMEM_LIMIT = 64 * 1024 * 1024           # <= v7x's 64 MiB; ample room on v5e/v6e


def _round_up(v, m):
    return (v + m - 1) // m * m


def _pick_row_tile(H, W, target_lanes=2048):
    """Largest TH dividing H with TH*W <= target_lanes and TH*W % 128 == 0
    (unmasked lane blocks).  Falls back to the whole image (always legal)."""
    if H * W <= target_lanes:
        return H
    if W > 128 and W % 128 != 0:
        return H                          # bottom-halo block not expressible
    best = H
    for th in range(1, H):
        if H % th == 0 and (th * W) % 128 == 0 and th * W <= target_lanes:
            best = th
    return best


def _pick_lane_block(HW, target_lanes=2048):
    """Lane-block size for the BN-apply pass: a multiple of 128 dividing HW."""
    if HW <= target_lanes:
        return HW
    best = HW
    for g in range(128, target_lanes + 1, 128):
        if HW % g == 0:
            best = g
    return best


def _make_conv_stats_kernel(Cin, W, TH, OFF, CP, has_dn):
    THW = TH * W

    def body(x_ref, dn_ref, w_ref, b_ref, mask_ref, out_ref, stats_ref,
             xpad, slab, carry):
        # x_ref    : (1, Cin, TH*W)  f32  current row tile (spatial on lanes)
        # dn_ref   : (1, Cin, Bh)    f32  128-lane block holding the next tile's
        #                                 first row (absent when n_tiles == 1)
        # w_ref    : (Cout, 9*CP)    bf16 flipped deconv weights, tap-major,
        #                                 K zero-padded to the bf16 sublane tile
        # b_ref    : (Cout, 1)       f32  conv bias
        # mask_ref : (3, TH*W)       f32  wrap-around column masks per kw
        # out_ref  : (1, Cout, TH*W) bf16 conv + bias (pre-BN)
        # stats_ref: (1, Cout, 128)  f32  resident accumulator; lane0 = sum,
        #                                 lane1 = sum_sq of the bias-free conv
        # xpad     : (Cin, Lpad)     f32  scratch: [top halo | tile | bot halo]
        # slab     : (9*CP, TH*W)    bf16 scratch: tile-aligned im2col slab
        # carry    : (Cin, W)        f32  scratch: previous tile's last row
        t = pl.program_id(1)
        last_t = pl.num_programs(1) - 1

        @pl.when(t == 0)
        def _():
            stats_ref[...] = jnp.zeros_like(stats_ref)

        # ---- H-padded, flattened, LeakyReLU'd tile in VMEM -------------------
        lk = x_ref[0].astype(jnp.float32)
        lk = jnp.where(lk >= 0, lk, LEAKY_SLOPE * lk)              # (Cin, TH*W)

        top = jnp.where(t == 0, 0.0, carry[...])                   # (Cin, W)
        if dn_ref is not None:
            nxt = dn_ref[0][:, :W].astype(jnp.float32)
            nxt = jnp.where(nxt >= 0, nxt, LEAKY_SLOPE * nxt)
            bot = jnp.where(t == last_t, 0.0, nxt)
        else:
            bot = jnp.zeros((Cin, W), jnp.float32)

        zcol = jnp.zeros((Cin, 1), jnp.float32)
        xpad[:, OFF - 1:OFF] = zcol                                # left guard
        xpad[:, OFF:OFF + W] = top                                 # top halo row
        xpad[:, OFF + W:OFF + W + THW] = lk                        # 128-aligned
        xpad[:, OFF + (TH + 1) * W:OFF + (TH + 2) * W] = bot       # bottom halo
        xpad[:, OFF + (TH + 2) * W:OFF + (TH + 2) * W + 1] = zcol  # right guard
        carry[...] = lk[:, THW - W:THW]                            # halo of t+1

        # ---- tile-aligned im2col slab + one fat-K bf16 MXU matmul ------------
        m0 = mask_ref[0:1, :]
        m2 = mask_ref[2:3, :]
        for tap in range(9):
            kh, kw = divmod(tap, 3)
            s = OFF + kh * W + (kw - 1)
            tapv = xpad[:, s:s + THW]                              # (Cin, TH*W)
            if kw == 0:                                            # mask in f32
                tapv = tapv * m0
            elif kw == 2:
                tapv = tapv * m2
            r = tap * CP
            slab[r:r + Cin, :] = tapv.astype(jnp.bfloat16)
            if CP != Cin:                                          # keep pad rows
                slab[r + Cin:r + CP, :] = jnp.zeros((CP - Cin, THW), jnp.bfloat16)

        acc = jnp.dot(w_ref[...], slab[...],                       # (Cout, TH*W)
                      preferred_element_type=jnp.float32)

        # Shifted sums: stats of the bias-free conv (variance is unchanged by
        # the +bias shift, mean is corrected in the wrapper).
        stats_ref[0, :, 0:1] += jnp.sum(acc, axis=1, keepdims=True)
        stats_ref[0, :, 1:2] += jnp.sum(acc * acc, axis=1, keepdims=True)

        out_ref[0] = (acc + b_ref[...]).astype(out_ref.dtype)      # lane-dense

    if has_dn:
        def kernel(x_ref, dn_ref, w_ref, b_ref, mask_ref, out_ref, stats_ref,
                   xpad, slab, carry):
            body(x_ref, dn_ref, w_ref, b_ref, mask_ref, out_ref, stats_ref,
                 xpad, slab, carry)
    else:
        def kernel(x_ref, w_ref, b_ref, mask_ref, out_ref, stats_ref,
                   xpad, slab, carry):
            body(x_ref, None, w_ref, b_ref, mask_ref, out_ref, stats_ref,
                 xpad, slab, carry)
    return kernel


def _bn_apply_kernel(y_ref, scale_ref, shift_ref, o_ref):
    # y_ref: (1, Cout, G) bf16; o_ref: (1, Cout, G) f32; scale/shift: (Cout, 1).
    o_ref[0] = y_ref[0].astype(jnp.float32) * scale_ref[...] + shift_ref[...]


@functools.partial(jax.jit, static_argnames=("row_tile",))
def deconv_block_forward(x_nchw, w_pt, bias, gamma, beta, *, row_tile=None):
    """DeconvBlock(batch_norm=True, dropout=False) forward.

    x_nchw : (N, Cin, H, W) f32        w_pt : (Cin, Cout, 3, 3) (PyTorch layout)
    bias, gamma, beta : (Cout,)        returns (N, Cout, H, W) f32
    """
    N, Cin, H, W = x_nchw.shape
    Cout = w_pt.shape[1]
    HW = H * W

    TH = row_tile if row_tile is not None else _pick_row_tile(H, W)
    assert H % TH == 0, "row_tile must divide H"
    THW = TH * W
    n_tiles = H // TH
    multi_tile = n_tiles > 1
    if multi_tile:
        assert THW % 128 == 0, "row_tile*W must be a multiple of 128 when tiling"
        assert W <= 128 or W % 128 == 0, "W must be <=128 or a multiple of 128"
    Bh = W if (W % 128 == 0) else 128          # bottom-halo lane-block size

    CP = _round_up(Cin, _BF16_SUBLANES)        # per-tap row pitch in the slab
    OFF = _round_up(W + 1, 128) - W            # left guard; OFF + W is 128-aligned
    Lpad = _round_up(OFF + (TH + 2) * W + 1, 128)

    # ConvTranspose2d(s=1, p=1) == Conv2d(pad=1) with spatially flipped kernel
    # and swapped channel axes.  Layout (Cout, [tap, ci]) with ci padded to the
    # bf16 sublane tile so slab rows line up; pad columns are zero.
    w_conv = jnp.transpose(w_pt[:, :, ::-1, ::-1], (1, 2, 3, 0))   # (Cout,3,3,Cin)
    w_slab = jnp.zeros((Cout, 9, CP), jnp.float32)
    w_slab = w_slab.at[:, :, :Cin].set(w_conv.reshape(Cout, 9, Cin))
    w2 = w_slab.reshape(Cout, 9 * CP).astype(jnp.bfloat16)
    bias2 = bias.reshape(Cout, 1).astype(jnp.float32)

    # Wrap-around column masks (exact 0/1) for the flat-shift taps, in f32.
    col = jnp.arange(THW, dtype=jnp.int32) % W
    masks = jnp.stack([(col != 0).astype(jnp.float32),
                       jnp.ones((THW,), jnp.float32),
                       (col != W - 1).astype(jnp.float32)], axis=0)  # (3, TH*W)

    x_flat = x_nchw.reshape(N, Cin, HW).astype(jnp.float32)         # free reshape

    in_specs = [pl.BlockSpec((1, Cin, THW), lambda n, t: (n, 0, t))]
    operands = [x_flat]
    if multi_tile:
        nb = THW // Bh
        last_b = HW // Bh - 1
        in_specs.append(pl.BlockSpec(
            (1, Cin, Bh),
            lambda n, t: (n, 0, jnp.minimum((t + 1) * nb, last_b))))
        operands.append(x_flat)
    in_specs += [
        pl.BlockSpec((Cout, 9 * CP), lambda n, t: (0, 0)),
        pl.BlockSpec((Cout, 1), lambda n, t: (0, 0)),
        pl.BlockSpec((3, THW), lambda n, t: (0, 0)),
    ]
    operands += [w2, bias2, masks]

    conv_kernel = _make_conv_stats_kernel(Cin, W, TH, OFF, CP, multi_tile)
    conv_out, stats = pl.pallas_call(
        conv_kernel,
        grid=(N, n_tiles),
        in_specs=in_specs,
        out_specs=[
            pl.BlockSpec((1, Cout, THW), lambda n, t: (n, 0, t)),
            pl.BlockSpec((1, Cout, 128), lambda n, t: (n, 0, 0)),   # resident acc
        ],
        out_shape=[
            jax.ShapeDtypeStruct((N, Cout, HW), jnp.bfloat16),      # bf16 HBM pass
            jax.ShapeDtypeStruct((N, Cout, 128), jnp.float32),
        ],
        scratch_shapes=[
            pltpu.VMEM((Cin, Lpad), jnp.float32),
            pltpu.VMEM((9 * CP, THW), jnp.bfloat16),
            pltpu.VMEM((Cin, W), jnp.float32),
        ],
        compiler_params=pltpu.CompilerParams(
            dimension_semantics=("parallel", "arbitrary"),
            vmem_limit_bytes=_VMEM_LIMIT),
        # Note: for N == 1 on v7x, split the batch axis into H-halves (summing
        # the two stats partials in the wrapper) so both TensorCores are busy.
    )(*operands)

    # ---- finalize BatchNorm statistics (tiny) and fold the affine ------------
    count = float(N * HW)
    totals = jnp.sum(stats, axis=0)                   # (Cout, 128)
    mean_nb = totals[:, 0] / count                    # mean of bias-free conv
    var = jnp.maximum(totals[:, 1] / count - mean_nb * mean_nb, 0.0)
    inv_std = jax.lax.rsqrt(var + BN_EPS)
    scale = gamma * inv_std
    shift = beta - (mean_nb + bias) * scale
    scale = scale.reshape(Cout, 1).astype(jnp.float32)
    shift = shift.reshape(Cout, 1).astype(jnp.float32)
    # TODO(synk): BatchNorm2d running_mean/running_var side-state is not updated
    # (forward activation only, matching the module's return value).

    G = _pick_lane_block(HW)
    y = pl.pallas_call(
        _bn_apply_kernel,
        grid=(N, HW // G),
        in_specs=[
            pl.BlockSpec((1, Cout, G), lambda n, g: (n, 0, g)),
            pl.BlockSpec((Cout, 1), lambda n, g: (0, 0)),
            pl.BlockSpec((Cout, 1), lambda n, g: (0, 0)),
        ],
        out_specs=pl.BlockSpec((1, Cout, G), lambda n, g: (n, 0, g)),
        out_shape=jax.ShapeDtypeStruct((N, Cout, HW), jnp.float32),
        compiler_params=pltpu.CompilerParams(
            dimension_semantics=("parallel", "parallel"),
            vmem_limit_bytes=_VMEM_LIMIT),
    )(conv_out, scale, shift)

    return y.reshape(N, Cout, H, W)


def _reference_forward(x_nchw, w_pt, bias, gamma, beta):
    """Pure-JAX (XLA) reference with identical math, for the sanity check."""
    x = jnp.where(x_nchw >= 0, x_nchw, LEAKY_SLOPE * x_nchw)
    w_conv = jnp.transpose(w_pt[:, :, ::-1, ::-1], (1, 0, 2, 3))   # (Cout,Cin,3,3)
    out = jax.lax.conv_general_dilated(
        x, w_conv, window_strides=(1, 1), padding=((1, 1), (1, 1)),
        dimension_numbers=("NCHW", "OIHW", "NCHW"))
    out = out + bias[None, :, None, None]
    mean = jnp.mean(out, axis=(0, 2, 3), keepdims=True)
    var = jnp.mean((out - mean) ** 2, axis=(0, 2, 3), keepdims=True)
    y = (out - mean) * jax.lax.rsqrt(var + BN_EPS)
    return y * gamma[None, :, None, None] + beta[None, :, None, None]


if __name__ == "__main__":
    key = jax.random.PRNGKey(0)
    k1, k2, k3, k4, k5 = jax.random.split(key, 5)

    N, Cin, Cout, H, W = 2, 4, 8, 16, 16

    x = jax.random.normal(k1, (N, Cin, H, W), jnp.float32)
    # ConvTranspose2d weight layout: (in_channels, out_channels, kH, kW)
    w_pt = 0.1 * jax.random.normal(k2, (Cin, Cout, 3, 3), jnp.float32)
    bias = 0.1 * jax.random.normal(k3, (Cout,), jnp.float32)
    gamma = 1.0 + 0.1 * jax.random.normal(k4, (Cout,), jnp.float32)
    beta = 0.1 * jax.random.normal(k5, (Cout,), jnp.float32)

    # row_tile=8 -> 2 row tiles per image, exercising the tiled grid, the halo
    # carry, the bottom-halo block, and the resident stats accumulator.
    out = deconv_block_forward(x, w_pt, bias, gamma, beta, row_tile=8)
    out = jax.block_until_ready(out)

    ref = _reference_forward(x, w_pt, bias, gamma, beta)
    assert out.shape == (N, Cout, H, W)
    err = float(jnp.max(jnp.abs(out - ref)))
    # bf16 MXU operands + bf16 intermediate storage (f32 accumulation/stats)
    # vs an all-f32 XLA reference; layout/indexing bugs would be O(1) errors.
    assert err < 5e-2, f"mismatch vs reference: max abs err = {err}"

    # TODO(synk): dropout branch (self.drop) not implemented — module default is dropout=False.
    print("KERNEL_OK")
</pallas_src>

<mosaic_0001>
module attributes {stable_mosaic.version = 11 : i64} {
  func.func @_bn_apply_kernel(%arg0: i32, %arg1: i32, %arg2: memref<1x8x256xbf16, #tpu.memory_space<vmem>>, %arg3: memref<8x1xf32, #tpu.memory_space<vmem>>, %arg4: memref<8x1xf32, #tpu.memory_space<vmem>>, %arg5: memref<1x8x256xf32, #tpu.memory_space<vmem>>) attributes {dimension_semantics = [#tpu.dimension_semantics<parallel>, #tpu.dimension_semantics<parallel>], iteration_bounds = array<i64: 2, 1>, scalar_prefetch = 0 : i64, scratch_operands = 0 : i64, tpu.core_type = #tpu.core_type<tc>, window_params = [{transform_indices = @transform_0, window_bounds = array<i64: 1, 8, 256>}, {pipeline_mode = #tpu.pipeline_mode<synchronous>, transform_indices = @transform_1, window_bounds = array<i64: 8, 1>}, {pipeline_mode = #tpu.pipeline_mode<synchronous>, transform_indices = @transform_2, window_bounds = array<i64: 8, 1>}, {transform_indices = @transform_3, window_bounds = array<i64: 1, 8, 256>}]} {
    %c0 = arith.constant 0 : index
    %c0_0 = arith.constant 0 : index
    %c0_1 = arith.constant 0 : index
    %0 = vector.load %arg2[%c0, %c0_0, %c0_1] : memref<1x8x256xbf16, #tpu.memory_space<vmem>>, vector<1x8x256xbf16>
    %1 = vector.shape_cast %0 : vector<1x8x256xbf16> to vector<8x256xbf16>
    %2 = arith.extf %1 : vector<8x256xbf16> to vector<8x256xf32>
    %c0_2 = arith.constant 0 : index
    %c0_3 = arith.constant 0 : index
    %3 = vector.load %arg3[%c0_2, %c0_3] : memref<8x1xf32, #tpu.memory_space<vmem>>, vector<8x1xf32>
    %4 = vector.broadcast %3 : vector<8x1xf32> to vector<8x256xf32>
    %5 = arith.mulf %2, %4 : vector<8x256xf32>
    %c0_4 = arith.constant 0 : index
    %c0_5 = arith.constant 0 : index
    %6 = vector.load %arg4[%c0_4, %c0_5] : memref<8x1xf32, #tpu.memory_space<vmem>>, vector<8x1xf32>
    %7 = vector.broadcast %6 : vector<8x1xf32> to vector<8x256xf32>
    %8 = arith.addf %5, %7 : vector<8x256xf32>
    %c0_6 = arith.constant 0 : index
    %c0_7 = arith.constant 0 : index
    %c0_8 = arith.constant 0 : index
    %9 = vector.load %arg5[%c0_6, %c0_7, %c0_8] : memref<1x8x256xf32, #tpu.memory_space<vmem>>, vector<1x8x256xf32>
    %10 = vector.shape_cast %9 : vector<1x8x256xf32> to vector<8x256xf32>
    %11 = vector.shape_cast %8 : vector<8x256xf32> to vector<1x8x256xf32>
    tpu.vector_store %arg5[%c0_6, %c0_7, %c0_8], %11 {strides = array<i32>} : memref<1x8x256xf32, #tpu.memory_space<vmem>>, vector<1x8x256xf32>,
    return
  }
  func.func @transform_0(%arg0: i32, %arg1: i32) -> (i32, i32, i32) {
    %c0_i32 = arith.constant 0 : i32
    %c0_i32_0 = arith.constant 0 : i32
    return %arg0, %c0_i32, %arg1 : i32, i32, i32
  }
  func.func @transform_1(%arg0: i32, %arg1: i32) -> (i32, i32) {
    %c0_i32 = arith.constant 0 : i32
    %c0_i32_0 = arith.constant 0 : i32
    %c0_i32_1 = arith.constant 0 : i32
    return %c0_i32, %c0_i32_0 : i32, i32
  }
  func.func @transform_2(%arg0: i32, %arg1: i32) -> (i32, i32) {
    %c0_i32 = arith.constant 0 : i32
    %c0_i32_0 = arith.constant 0 : i32
    %c0_i32_1 = arith.constant 0 : i32
    return %c0_i32, %c0_i32_0 : i32, i32
  }
  func.func @transform_3(%arg0: i32, %arg1: i32) -> (i32, i32, i32) {
    %c0_i32 = arith.constant 0 : i32
    %c0_i32_0 = arith.constant 0 : i32
    return %arg0, %c0_i32, %arg1 : i32, i32, i32
  }
}

module attributes {stable_mosaic.version = 11 : i64} {
  func.func @kernel(%arg0: i32, %arg1: i32, %arg2: memref<1x4x128xf32, #tpu.memory_space<vmem>>, %arg3: memref<1x4x128xf32, #tpu.memory_space<vmem>>, %arg4: memref<8x144xbf16, #tpu.memory_space<vmem>>, %arg5: memref<8x1xf32, #tpu.memory_space<vmem>>, %arg6: memref<3x128xf32, #tpu.memory_space<vmem>>, %arg7: memref<1x8x128xbf16, #tpu.memory_space<vmem>>, %arg8: memref<1x8x128xf32, #tpu.memory_space<vmem>>, %arg9: memref<4x384xf32, #tpu.memory_space<vmem>>, %arg10: memref<144x128xbf16, #tpu.memory_space<vmem>>, %arg11: memref<4x16xf32, #tpu.memory_space<vmem>>) attributes {dimension_semantics = [#tpu.dimension_semantics<parallel>, #tpu.dimension_semantics<arbitrary>], iteration_bounds = array<i64: 2, 2>, scalar_prefetch = 0 : i64, scratch_operands = 3 : i64, tpu.core_type = #tpu.core_type<tc>, window_params = [{transform_indices = @transform_0, window_bounds = array<i64: 1, 4, 128>}, {transform_indices = @transform_1, window_bounds = array<i64: 1, 4, 128>}, {pipeline_mode = #tpu.pipeline_mode<synchronous>, transform_indices = @transform_2, window_bounds = array<i64: 8, 144>}, {pipeline_mode = #tpu.pipeline_mode<synchronous>, transform_indices = @transform_3, window_bounds = array<i64: 8, 1>}, {pipeline_mode = #tpu.pipeline_mode<synchronous>, transform_indices = @transform_4, window_bounds = array<i64: 3, 128>}, {transform_indices = @transform_5, window_bounds = array<i64: 1, 8, 128>}, {transform_indices = @transform_6, window_bounds = array<i64: 1, 8, 128>}]} {
    %c0_i32 = arith.constant 0 : i32
    %0 = arith.cmpi eq, %arg1, %c0_i32 : i32
    %1 = arith.extui %0 : i1 to i32
    %c0_i32_0 = arith.constant 0 : i32
    %2 = arith.cmpi ne, %1, %c0_i32_0 : i32
    scf.if %2 {
      %cst_90 = arith.constant 0.000000e+00 : f32
      %119 = vector.broadcast %cst_90 : f32 to vector<1x8x128xf32>
      %c0_91 = arith.constant 0 : index
      %c0_92 = arith.constant 0 : index
      %c0_93 = arith.constant 0 : index
      %120 = vector.load %arg8[%c0_91, %c0_92, %c0_93] : memref<1x8x128xf32, #tpu.memory_space<vmem>>, vector<1x8x128xf32>
      tpu.vector_store %arg8[%c0_91, %c0_92, %c0_93], %119 {strides = array<i32>} : memref<1x8x128xf32, #tpu.memory_space<vmem>>, vector<1x8x128xf32>,
    } else {
    }
    %c0 = arith.constant 0 : index
    %c0_1 = arith.constant 0 : index
    %c0_2 = arith.constant 0 : index
    %3 = vector.load %arg2[%c0, %c0_1, %c0_2] : memref<1x4x128xf32, #tpu.memory_space<vmem>>, vector<1x4x128xf32>
    %4 = vector.shape_cast %3 : vector<1x4x128xf32> to vector<4x128xf32>
    %cst = arith.constant 0.000000e+00 : f32
    %5 = vector.broadcast %cst : f32 to vector<4x128xf32>
    %6 = arith.cmpf oge, %4, %5 : vector<4x128xf32>
    %cst_3 = arith.constant 2.000000e-01 : f32
    %7 = vector.broadcast %cst_3 : f32 to vector<4x128xf32>
    %8 = arith.mulf %7, %4 : vector<4x128xf32>
    %9 = arith.select %6, %4, %8 : vector<4x128xi1>, vector<4x128xf32>
    %c0_i32_4 = arith.constant 0 : i32
    %10 = arith.cmpi eq, %arg1, %c0_i32_4 : i32
    %c0_5 = arith.constant 0 : index
    %c0_6 = arith.constant 0 : index
    %11 = vector.load %arg11[%c0_5, %c0_6] : memref<4x16xf32, #tpu.memory_space<vmem>>, vector<4x16xf32>
    %cst_7 = arith.constant 0.000000e+00 : f32
    %12 = vector.broadcast %cst_7 : f32 to vector<4x16xf32>
    %13 = arith.select %10, %12, %11 : vector<4x16xf32>
    %c0_8 = arith.constant 0 : index
    %c0_9 = arith.constant 0 : index
    %c0_10 = arith.constant 0 : index
    %14 = vector.load %arg3[%c0_8, %c0_9, %c0_10] : memref<1x4x128xf32, #tpu.memory_space<vmem>>, vector<1x4x128xf32>
    %15 = vector.shape_cast %14 : vector<1x4x128xf32> to vector<4x128xf32>
    %16 = vector.extract_strided_slice %15 {offsets = [0, 0], sizes = [4, 16], strides = [1, 1]} : vector<4x128xf32> to vector<4x16xf32>
    %cst_11 = arith.constant 0.000000e+00 : f32
    %17 = vector.broadcast %cst_11 : f32 to vector<4x16xf32>
    %18 = arith.cmpf oge, %16, %17 : vector<4x16xf32>
    %cst_12 = arith.constant 2.000000e-01 : f32
    %19 = vector.broadcast %cst_12 : f32 to vector<4x16xf32>
    %20 = arith.mulf %19, %16 : vector<4x16xf32>
    %21 = arith.select %18, %16, %20 : vector<4x16xi1>, vector<4x16xf32>
    %c1_i32 = arith.constant 1 : i32
    %22 = arith.cmpi eq, %arg1, %c1_i32 : i32
    %cst_13 = arith.constant 0.000000e+00 : f32
    %23 = vector.broadcast %cst_13 : f32 to vector<4x16xf32>
    %24 = arith.select %22, %23, %21 : vector<4x16xf32>
    %cst_14 = arith.constant 0.000000e+00 : f32
    %25 = vector.broadcast %cst_14 : f32 to vector<4x1xf32>
    %c0_15 = arith.constant 0 : index
    %c111 = arith.constant 111 : index
    %26 = vector.load %arg9[%c0_15, %c111] : memref<4x384xf32, #tpu.memory_space<vmem>>, vector<4x1xf32>
    tpu.vector_store %arg9[%c0_15, %c111], %25 {strides = array<i32>} : memref<4x384xf32, #tpu.memory_space<vmem>>, vector<4x1xf32>,
    %c0_16 = arith.constant 0 : index
    %c112 = arith.constant 112 : index
    %27 = vector.load %arg9[%c0_16, %c112] : memref<4x384xf32, #tpu.memory_space<vmem>>, vector<4x16xf32>
    tpu.vector_store %arg9[%c0_16, %c112], %13 {strides = array<i32>} : memref<4x384xf32, #tpu.memory_space<vmem>>, vector<4x16xf32>,
    %c0_17 = arith.constant 0 : index
    %c128 = arith.constant 128 : index
    %28 = vector.load %arg9[%c0_17, %c128] : memref<4x384xf32, #tpu.memory_space<vmem>>, vector<4x128xf32>
    tpu.vector_store %arg9[%c0_17, %c128], %9 {strides = array<i32>} : memref<4x384xf32, #tpu.memory_space<vmem>>, vector<4x128xf32>,
    %c0_18 = arith.constant 0 : index
    %c256 = arith.constant 256 : index
    %29 = vector.load %arg9[%c0_18, %c256] : memref<4x384xf32, #tpu.memory_space<vmem>>, vector<4x16xf32>
    tpu.vector_store %arg9[%c0_18, %c256], %24 {strides = array<i32>} : memref<4x384xf32, #tpu.memory_space<vmem>>, vector<4x16xf32>,
    %c0_19 = arith.constant 0 : index
    %c272 = arith.constant 272 : index
    %30 = vector.load %arg9[%c0_19, %c272] : memref<4x384xf32, #tpu.memory_space<vmem>>, vector<4x1xf32>
    tpu.vector_store %arg9[%c0_19, %c272], %25 {strides = array<i32>} : memref<4x384xf32, #tpu.memory_space<vmem>>, vector<4x1xf32>,
    %31 = vector.extract_strided_slice %9 {offsets = [0, 112], sizes = [4, 16], strides = [1, 1]} : vector<4x128xf32> to vector<4x16xf32>
    %c0_20 = arith.constant 0 : index
    %c0_21 = arith.constant 0 : index
    %32 = vector.load %arg11[%c0_20, %c0_21] : memref<4x16xf32, #tpu.memory_space<vmem>>, vector<4x16xf32>
    tpu.vector_store %arg11[%c0_20, %c0_21], %31 {strides = array<i32>} : memref<4x16xf32, #tpu.memory_space<vmem>>, vector<4x16xf32>,
    %c0_22 = arith.constant 0 : index
    %c0_23 = arith.constant 0 : index
    %33 = vector.load %arg6[%c0_22, %c0_23] : memref<3x128xf32, #tpu.memory_space<vmem>>, vector<1x128xf32>
    %c2 = arith.constant 2 : index
    %c0_24 = arith.constant 0 : index
    %34 = vector.load %arg6[%c2, %c0_24] : memref<3x128xf32, #tpu.memory_space<vmem>>, vector<1x128xf32>
    %c0_25 = arith.constant 0 : index
    %c111_26 = arith.constant 111 : index
    %35 = vector.load %arg9[%c0_25, %c111_26] : memref<4x384xf32, #tpu.memory_space<vmem>>, vector<4x128xf32>
    %36 = vector.broadcast %33 : vector<1x128xf32> to vector<4x128xf32>
    %37 = arith.mulf %35, %36 : vector<4x128xf32>
    %38 = arith.truncf %37 : vector<4x128xf32> to vector<4x128xbf16>
    %c0_27 = arith.constant 0 : index
    %c0_28 = arith.constant 0 : index
    %39 = vector.load %arg10[%c0_27, %c0_28] : memref<144x128xbf16, #tpu.memory_space<vmem>>, vector<4x128xbf16>
    tpu.vector_store %arg10[%c0_27, %c0_28], %38 {strides = array<i32>} : memref<144x128xbf16, #tpu.memory_space<vmem>>, vector<4x128xbf16>,
    %cst_29 = arith.constant 0.000000e+00 : bf16
    %40 = vector.broadcast %cst_29 : bf16 to vector<12x128xbf16>
    %c4 = arith.constant 4 : index
    %c0_30 = arith.constant 0 : index
    %41 = vector.load %arg10[%c4, %c0_30] : memref<144x128xbf16, #tpu.memory_space<vmem>>, vector<12x128xbf16>
    tpu.vector_store %arg10[%c4, %c0_30], %40 {strides = array<i32>} : memref<144x128xbf16, #tpu.memory_space<vmem>>, vector<12x128xbf16>,
    %c0_31 = arith.constant 0 : index
    %c112_32 = arith.constant 112 : index
    %42 = vector.load %arg9[%c0_31, %c112_32] : memref<4x384xf32, #tpu.memory_space<vmem>>, vector<4x128xf32>
    %43 = arith.truncf %42 : vector<4x128xf32> to vector<4x128xbf16>
    %c16 = arith.constant 16 : index
    %c0_33 = arith.constant 0 : index
    %44 = vector.load %arg10[%c16, %c0_33] : memref<144x128xbf16, #tpu.memory_space<vmem>>, vector<4x128xbf16>
    tpu.vector_store %arg10[%c16, %c0_33], %43 {strides = array<i32>} : memref<144x128xbf16, #tpu.memory_space<vmem>>, vector<4x128xbf16>,
    %cst_34 = arith.constant 0.000000e+00 : bf16
    %45 = vector.broadcast %cst_34 : bf16 to vector<12x128xbf16>
    %c20 = arith.constant 20 : index
    %c0_35 = arith.constant 0 : index
    %46 = vector.load %arg10[%c20, %c0_35] : memref<144x128xbf16, #tpu.memory_space<vmem>>, vector<12x128xbf16>
    tpu.vector_store %arg10[%c20, %c0_35], %45 {strides = array<i32>} : memref<144x128xbf16, #tpu.memory_space<vmem>>, vector<12x128xbf16>,
    %c0_36 = arith.constant 0 : index
    %c113 = arith.constant 113 : index
    %47 = vector.load %arg9[%c0_36, %c113] : memref<4x384xf32, #tpu.memory_space<vmem>>, vector<4x128xf32>
    %48 = vector.broadcast %34 : vector<1x128xf32> to vector<4x128xf32>
    %49 = arith.mulf %47, %48 : vector<4x128xf32>
    %50 = arith.truncf %49 : vector<4x128xf32> to vector<4x128xbf16>
    %c32 = arith.constant 32 : index
    %c0_37 = arith.constant 0 : index
    %51 = vector.load %arg10[%c32, %c0_37] : memref<144x128xbf16, #tpu.memory_space<vmem>>, vector<4x128xbf16>
    tpu.vector_store %arg10[%c32, %c0_37], %50 {strides = array<i32>} : memref<144x128xbf16, #tpu.memory_space<vmem>>, vector<4x128xbf16>,
    %cst_38 = arith.constant 0.000000e+00 : bf16
    %52 = vector.broadcast %cst_38 : bf16 to vector<12x128xbf16>
    %c36 = arith.constant 36 : index
    %c0_39 = arith.constant 0 : index
    %53 = vector.load %arg10[%c36, %c0_39] : memref<144x128xbf16, #tpu.memory_space<vmem>>, vector<12x128xbf16>
    tpu.vector_store %arg10[%c36, %c0_39], %52 {strides = array<i32>} : memref<144x128xbf16, #tpu.memory_space<vmem>>, vector<12x128xbf16>,
    %c0_40 = arith.constant 0 : index
    %c127 = arith.constant 127 : index
    %54 = vector.load %arg9[%c0_40, %c127] : memref<4x384xf32, #tpu.memory_space<vmem>>, vector<4x128xf32>
    %55 = vector.broadcast %33 : vector<1x128xf32> to vector<4x128xf32>
    %56 = arith.mulf %54, %55 : vector<4x128xf32>
    %57 = arith.truncf %56 : vector<4x128xf32> to vector<4x128xbf16>
    %c48 = arith.constant 48 : index
    %c0_41 = arith.constant 0 : index
    %58 = vector.load %arg10[%c48, %c0_41] : memref<144x128xbf16, #tpu.memory_space<vmem>>, vector<4x128xbf16>
    tpu.vector_store %arg10[%c48, %c0_41], %57 {strides = array<i32>} : memref<144x128xbf16, #tpu.memory_space<vmem>>, vector<4x128xbf16>,
    %cst_42 = arith.constant 0.000000e+00 : bf16
    %59 = vector.broadcast %cst_42 : bf16 to vector<12x128xbf16>
    %c52 = arith.constant 52 : index
    %c0_43 = arith.constant 0 : index
    %60 = vector.load %arg10[%c52, %c0_43] : memref<144x128xbf16, #tpu.memory_space<vmem>>, vector<12x128xbf16>
    tpu.vector_store %arg10[%c52, %c0_43], %59 {strides = array<i32>} : memref<144x128xbf16, #tpu.memory_space<vmem>>, vector<12x128xbf16>,
    %c0_44 = arith.constant 0 : index
    %c128_45 = arith.constant 128 : index
    %61 = vector.load %arg9[%c0_44, %c128_45] : memref<4x384xf32, #tpu.memory_space<vmem>>, vector<4x128xf32>
    %62 = arith.truncf %61 : vector<4x128xf32> to vector<4x128xbf16>
    %c64 = arith.constant 64 : index
    %c0_46 = arith.constant 0 : index
    %63 = vector.load %arg10[%c64, %c0_46] : memref<144x128xbf16, #tpu.memory_space<vmem>>, vector<4x128xbf16>
    tpu.vector_store %arg10[%c64, %c0_46], %62 {strides = array<i32>} : memref<144x128xbf16, #tpu.memory_space<vmem>>, vector<4x128xbf16>,
    %cst_47 = arith.constant 0.000000e+00 : bf16
    %64 = vector.broadcast %cst_47 : bf16 to vector<12x128xbf16>
    %c68 = arith.constant 68 : index
    %c0_48 = arith.constant 0 : index
    %65 = vector.load %arg10[%c68, %c0_48] : memref<144x128xbf16, #tpu.memory_space<vmem>>, vector<12x128xbf16>
    tpu.vector_store %arg10[%c68, %c0_48], %64 {strides = array<i32>} : memref<144x128xbf16, #tpu.memory_space<vmem>>, vector<12x128xbf16>,
    %c0_49 = arith.constant 0 : index
    %c129 = arith.constant 129 : index
    %66 = vector.load %arg9[%c0_49, %c129] : memref<4x384xf32, #tpu.memory_space<vmem>>, vector<4x128xf32>
    %67 = vector.broadcast %34 : vector<1x128xf32> to vector<4x128xf32>
    %68 = arith.mulf %66, %67 : vector<4x128xf32>
    %69 = arith.truncf %68 : vector<4x128xf32> to vector<4x128xbf16>
    %c80 = arith.constant 80 : index
    %c0_50 = arith.constant 0 : index
    %70 = vector.load %arg10[%c80, %c0_50] : memref<144x128xbf16, #tpu.memory_space<vmem>>, vector<4x128xbf16>
    tpu.vector_store %arg10[%c80, %c0_50], %69 {strides = array<i32>} : memref<144x128xbf16, #tpu.memory_space<vmem>>, vector<4x128xbf16>,
    %cst_51 = arith.constant 0.000000e+00 : bf16
    %71 = vector.broadcast %cst_51 : bf16 to vector<12x128xbf16>
    %c84 = arith.constant 84 : index
    %c0_52 = arith.constant 0 : index
    %72 = vector.load %arg10[%c84, %c0_52] : memref<144x128xbf16, #tpu.memory_space<vmem>>, vector<12x128xbf16>
    tpu.vector_store %arg10[%c84, %c0_52], %71 {strides = array<i32>} : memref<144x128xbf16, #tpu.memory_space<vmem>>, vector<12x128xbf16>,
    %c0_53 = arith.constant 0 : index
    %c143 = arith.constant 143 : index
    %73 = vector.load %arg9[%c0_53, %c143] : memref<4x384xf32, #tpu.memory_space<vmem>>, vector<4x128xf32>
    %74 = vector.broadcast %33 : vector<1x128xf32> to vector<4x128xf32>
    %75 = arith.mulf %73, %74 : vector<4x128xf32>
    %76 = arith.truncf %75 : vector<4x128xf32> to vector<4x128xbf16>
    %c96 = arith.constant 96 : index
    %c0_54 = arith.constant 0 : index
    %77 = vector.load %arg10[%c96, %c0_54] : memref<144x128xbf16, #tpu.memory_space<vmem>>, vector<4x128xbf16>
    tpu.vector_store %arg10[%c96, %c0_54], %76 {strides = array<i32>} : memref<144x128xbf16, #tpu.memory_space<vmem>>, vector<4x128xbf16>,
    %cst_55 = arith.constant 0.000000e+00 : bf16
    %78 = vector.broadcast %cst_55 : bf16 to vector<12x128xbf16>
    %c100 = arith.constant 100 : index
    %c0_56 = arith.constant 0 : index
    %79 = vector.load %arg10[%c100, %c0_56] : memref<144x128xbf16, #tpu.memory_space<vmem>>, vector<12x128xbf16>
    tpu.vector_store %arg10[%c100, %c0_56], %78 {strides = array<i32>} : memref<144x128xbf16, #tpu.memory_space<vmem>>, vector<12x128xbf16>,
    %c0_57 = arith.constant 0 : index
    %c144 = arith.constant 144 : index
    %80 = vector.load %arg9[%c0_57, %c144] : memref<4x384xf32, #tpu.memory_space<vmem>>, vector<4x128xf32>
    %81 = arith.truncf %80 : vector<4x128xf32> to vector<4x128xbf16>
    %c112_58 = arith.constant 112 : index
    %c0_59 = arith.constant 0 : index
    %82 = vector.load %arg10[%c112_58, %c0_59] : memref<144x128xbf16, #tpu.memory_space<vmem>>, vector<4x128xbf16>
    tpu.vector_store %arg10[%c112_58, %c0_59], %81 {strides = array<i32>} : memref<144x128xbf16, #tpu.memory_space<vmem>>, vector<4x128xbf16>,
    %cst_60 = arith.constant 0.000000e+00 : bf16
    %83 = vector.broadcast %cst_60 : bf16 to vector<12x128xbf16>
    %c116 = arith.constant 116 : index
    %c0_61 = arith.constant 0 : index
    %84 = vector.load %arg10[%c116, %c0_61] : memref<144x128xbf16, #tpu.memory_space<vmem>>, vector<12x128xbf16>
    tpu.vector_store %arg10[%c116, %c0_61], %83 {strides = array<i32>} : memref<144x128xbf16, #tpu.memory_space<vmem>>, vector<12x128xbf16>,
    %c0_62 = arith.constant 0 : index
    %c145 = arith.constant 145 : index
    %85 = vector.load %arg9[%c0_62, %c145] : memref<4x384xf32, #tpu.memory_space<vmem>>, vector<4x128xf32>
    %86 = vector.broadcast %34 : vector<1x128xf32> to vector<4x128xf32>
    %87 = arith.mulf %85, %86 : vector<4x128xf32>
    %88 = arith.truncf %87 : vector<4x128xf32> to vector<4x128xbf16>
    %c128_63 = arith.constant 128 : index
    %c0_64 = arith.constant 0 : index
    %89 = vector.load %arg10[%c128_63, %c0_64] : memref<144x128xbf16, #tpu.memory_space<vmem>>, vector<4x128xbf16>
    tpu.vector_store %arg10[%c128_63, %c0_64], %88 {strides = array<i32>} : memref<144x128xbf16, #tpu.memory_space<vmem>>, vector<4x128xbf16>,
    %cst_65 = arith.constant 0.000000e+00 : bf16
    %90 = vector.broadcast %cst_65 : bf16 to vector<12x128xbf16>
    %c132 = arith.constant 132 : index
    %c0_66 = arith.constant 0 : index
    %91 = vector.load %arg10[%c132, %c0_66] : memref<144x128xbf16, #tpu.memory_space<vmem>>, vector<12x128xbf16>
    tpu.vector_store %arg10[%c132, %c0_66], %90 {strides = array<i32>} : memref<144x128xbf16, #tpu.memory_space<vmem>>, vector<12x128xbf16>,
    %c0_67 = arith.constant 0 : index
    %c0_68 = arith.constant 0 : index
    %92 = vector.load %arg4[%c0_67, %c0_68] : memref<8x144xbf16, #tpu.memory_space<vmem>>, vector<8x144xbf16>
    %c0_69 = arith.constant 0 : index
    %c0_70 = arith.constant 0 : index
    %93 = vector.load %arg10[%c0_69, %c0_70] : memref<144x128xbf16, #tpu.memory_space<vmem>>, vector<144x128xbf16>
    %cst_71 = arith.constant dense<0.000000e+00> : vector<8x128xf32>
    %94 = tpu.matmul %92, %93, %cst_71 {dimension_numbers = #tpu.dot_dimension_numbers<[1], [0], [0], [1], [0, 0, 1, 1], [], []>} : vector<8x144xbf16>, vector<144x128xbf16>, vector<8x128xf32> -> vector<8x128xf32>
    %c0_72 = arith.constant 0 : index
    %c0_73 = arith.constant 0 : index
    %c0_74 = arith.constant 0 : index
    %95 = vector.load %arg8[%c0_72, %c0_73, %c0_74] : memref<1x8x128xf32, #tpu.memory_space<vmem>>, vector<1x8x1xf32>
    %96 = vector.shape_cast %95 : vector<1x8x1xf32> to vector<8x1xf32>
    %cst_75 = arith.constant dense<0.000000e+00> : vector<8xf32>
    %97 = vector.multi_reduction <add>, %94, %cst_75 [1] : vector<8x128xf32> to vector<8xf32>
    %98 = vector.shape_cast %97 : vector<8xf32> to vector<8x1xf32>
    %99 = arith.addf %96, %98 : vector<8x1xf32>
    %c0_76 = arith.constant 0 : index
    %c0_77 = arith.constant 0 : index
    %c0_78 = arith.constant 0 : index
    %100 = vector.load %arg8[%c0_76, %c0_77, %c0_78] : memref<1x8x128xf32, #tpu.memory_space<vmem>>, vector<1x8x1xf32>
    %101 = vector.shape_cast %100 : vector<1x8x1xf32> to vector<8x1xf32>
    %102 = vector.shape_cast %99 : vector<8x1xf32> to vector<1x8x1xf32>
    tpu.vector_store %arg8[%c0_76, %c0_77, %c0_78], %102 {strides = array<i32>} : memref<1x8x128xf32, #tpu.memory_space<vmem>>, vector<1x8x1xf32>,
    %c0_79 = arith.constant 0 : index
    %c0_80 = arith.constant 0 : index
    %c1 = arith.constant 1 : index
    %103 = vector.load %arg8[%c0_79, %c0_80, %c1] : memref<1x8x128xf32, #tpu.memory_space<vmem>>, vector<1x8x1xf32>
    %104 = vector.shape_cast %103 : vector<1x8x1xf32> to vector<8x1xf32>
    %105 = arith.mulf %94, %94 : vector<8x128xf32>
    %cst_81 = arith.constant dense<0.000000e+00> : vector<8xf32>
    %106 = vector.multi_reduction <add>, %105, %cst_81 [1] : vector<8x128xf32> to vector<8xf32>
    %107 = vector.shape_cast %106 : vector<8xf32> to vector<8x1xf32>
    %108 = arith.addf %104, %107 : vector<8x1xf32>
    %c0_82 = arith.constant 0 : index
    %c0_83 = arith.constant 0 : index
    %c1_84 = arith.constant 1 : index
    %109 = vector.load %arg8[%c0_82, %c0_83, %c1_84] : memref<1x8x128xf32, #tpu.memory_space<vmem>>, vector<1x8x1xf32>
    %110 = vector.shape_cast %109 : vector<1x8x1xf32> to vector<8x1xf32>
    %111 = vector.shape_cast %108 : vector<8x1xf32> to vector<1x8x1xf32>
    tpu.vector_store %arg8[%c0_82, %c0_83, %c1_84], %111 {strides = array<i32>} : memref<1x8x128xf32, #tpu.memory_space<vmem>>, vector<1x8x1xf32>,
    %c0_85 = arith.constant 0 : index
    %c0_86 = arith.constant 0 : index
    %112 = vector.load %arg5[%c0_85, %c0_86] : memref<8x1xf32, #tpu.memory_space<vmem>>, vector<8x1xf32>
    %113 = vector.broadcast %112 : vector<8x1xf32> to vector<8x128xf32>
    %114 = arith.addf %94, %113 : vector<8x128xf32>
    %115 = arith.truncf %114 : vector<8x128xf32> to vector<8x128xbf16>
    %c0_87 = arith.constant 0 : index
    %c0_88 = arith.constant 0 : index
    %c0_89 = arith.constant 0 : index
    %116 = vector.load %arg7[%c0_87, %c0_88, %c0_89] : memref<1x8x128xbf16, #tpu.memory_space<vmem>>, vector<1x8x128xbf16>
    %117 = vector.shape_cast %116 : vector<1x8x128xbf16> to vector<8x128xbf16>
    %118 = vector.shape_cast %115 : vector<8x128xbf16> to vector<1x8x128xbf16>
    tpu.vector_store %arg7[%c0_87, %c0_88, %c0_89], %118 {strides = array<i32>} : memref<1x8x128xbf16, #tpu.memory_space<vmem>>, vector<1x8x128xbf16>,
    return
  }
  func.func @transform_0(%arg0: i32, %arg1: i32) -> (i32, i32, i32) {
    %c0_i32 = arith.constant 0 : i32
    %c0_i32_0 = arith.constant 0 : i32
    return %arg0, %c0_i32, %arg1 : i32, i32, i32
  }
  func.func @transform_1(%arg0: i32, %arg1: i32) -> (i32, i32, i32) {
    %c1_i32 = arith.constant 1 : i32
    %0 = arith.addi %arg1, %c1_i32 : i32
    %c1_i32_0 = arith.constant 1 : i32
    %1 = arith.muli %0, %c1_i32_0 : i32
    %c1_i32_1 = arith.constant 1 : i32
    %2 = arith.minsi %1, %c1_i32_1 : i32
    %c0_i32 = arith.constant 0 : i32
    %c0_i32_2 = arith.constant 0 : i32
    return %arg0, %c0_i32, %2 : i32, i32, i32
  }
  func.func @transform_2(%arg0: i32, %arg1: i32) -> (i32, i32) {
    %c0_i32 = arith.constant 0 : i32
    %c0_i32_0 = arith.constant 0 : i32
    %c0_i32_1 = arith.constant 0 : i32
    return %c0_i32, %c0_i32_0 : i32, i32
  }
  func.func @transform_3(%arg0: i32, %arg1: i32) -> (i32, i32) {
    %c0_i32 = arith.constant 0 : i32
    %c0_i32_0 = arith.constant 0 : i32
    %c0_i32_1 = arith.constant 0 : i32
    return %c0_i32, %c0_i32_0 : i32, i32
  }
  func.func @transform_4(%arg0: i32, %arg1: i32) -> (i32, i32) {
    %c0_i32 = arith.constant 0 : i32
    %c0_i32_0 = arith.constant 0 : i32
    %c0_i32_1 = arith.constant 0 : i32
    return %c0_i32, %c0_i32_0 : i32, i32
  }
  func.func @transform_5(%arg0: i32, %arg1: i32) -> (i32, i32, i32) {
    %c0_i32 = arith.constant 0 : i32
    %c0_i32_0 = arith.constant 0 : i32
    return %arg0, %c0_i32, %arg1 : i32, i32, i32
  }
  func.func @transform_6(%arg0: i32, %arg1: i32) -> (i32, i32, i32) {
    %c0_i32 = arith.constant 0 : i32
    %c0_i32_0 = arith.constant 0 : i32
    %c0_i32_1 = arith.constant 0 : i32
    return %arg0, %c0_i32, %c0_i32_0 : i32, i32, i32
  }
}

</mosaic_0001>

<bundles_post_ra>
// kernel: deconv_block_forward.3
= control target key start
LH: loop header
LB: loop body
LE: loop exit
PB: predicated region body
PF: predicated region fallthrough
CT: control target
= control target key end

     0   :  { %s402_s12 = smov 0   ;;  %s404_s13 = smov 0   ;;  %s441_s0 = inlined_call_operand.vmem [shape: bf16[2,8,256], index: 0, kind: input, shape index: {}]   ;;  %s442_s1 = inlined_call_operand.vmem [shape: f32[8,1], index: 1, kind: input, shape index: {}]   ;;  %s443_s2 = inlined_call_operand.vmem [shape: f32[8,1], index: 2, kind: input, shape index: {}]   ;;  %s444_s3 = inlined_call_operand.vmem [shape: f32[2,8,256], index: 3, kind: output, shape index: {}]  }
   0x1   :  { %s406_s14 = smov 0  }
   0x2 LB: > { %s25_s15 = sadd.s32 1, %s375_s13  ;;  %p322_p0 = scmp.ge.s32.totalorder %s379_s14, 1  ;;  %s379_s14 = sphi %s406_s14, %s13_s14   ;;  %s375_s13 = sphi %s404_s13, %s446_s13   ;;  %s371_s12 = sphi %s402_s12, %s445_s12  }
   0x3   : > { %p27_p1 = scmp.ge.s32.totalorder %s25_s15, 2  ;;  %p158_p2 = scmp.lt.s32.totalorder %s379_s14, 3 }
   0x5   : > { %s448_s15 = smov (%p27_p1, %s25_s15), 0  ;;  %p159_p3 = pnand %p322_p0, %p158_p2 }
   0x6   : > { %p191_p4 = scmp.lt.s32.totalorder (!%p159_p3), %s371_s12, 1 }
   0x7   : > { %162 = sbr.rel (%p159_p3) target bundleno = 145 (0x91), region = 32 }
   0xc   : > { %v213_v0 = vld [vmem:[%s442_s1] sm:$0xff]  ;;  %v381_v1 = vmov 0   ;;  %s450_s12 = smov (!%p191_p4, %s371_s12), 1 }
   0xd   : > { %356 = vset.pattern.permute.xlu0 %v381_v1  ;;  %v221_v2 = vld [vmem:[%s443_s2] sm:$0xff]  ;;  %s329_s20 = sshll.u32 %s450_s12, 3  ;;  %s330_s24 = sshll.u32 %s450_s12, 4 }
   0xe   : > { %216 = vperm.xlu0 %356, %v213_v0   ;;  %s198_s23 = scalar_lea.vmem %s441_s0, %s329_s20  ;;  %s208_s27 = scalar_lea.vmem %s444_s3, %s330_s24 }
   0xf   : > { %v210_v3 = vld [vmem:[%s198_s23] sm:$0xff] }
  0x10   : > { %v211_v4 = vunpack.c.l.bf16 %v210_v3  ;;  %v212_v5 = vunpack.c.h.bf16 %v210_v3 }
  0x12   : > { %224 = vperm.xlu0 %356, %v221_v2  }
  0x89   : > { %v217_v6 = vpop.permute.xlu0 %216 }
  0x8a   : > { %v219_v7 = vmul.f32 %v217_v6, %v211_v4  ;;  %v220_v8 = vmul.f32 %v217_v6, %v212_v5 }
  0x8d   : > { %v225_v9 = vpop.permute.xlu0 %224 }
  0x8e   : > { %v227_v10 = vadd.f32 %v225_v9, %v219_v7  ;;  %v228_v11 = vadd.f32 %v225_v9, %v220_v8 }
  0x90   : > { %229 = vst [vmem:[%s208_s27] sm:$0xff] %v227_v10  ;;  %230 = vst [vmem:[%s208_s27 + $0x8] sm:$0xff] %v228_v11 }
  0x91 PF: > { %s13_s14 = sadd.s32 1, %s379_s14   ;;  %s445_s12 = smov %s375_s13 }
  0x92   : > { %p10_p5 = scmp.ge.s32.totalorder %s13_s14, 4   ;;  %s446_s13 = smov %s448_s15 }
  0x94   :  { %12 = sbr.rel (!%p10_p5) target bundleno = 2 (0x2), region = 62 }

// kernel: deconv_block_forward.2
= control target key start
LH: loop header
LB: loop body
LE: loop exit
PB: predicated region body
PF: predicated region fallthrough
CT: control target
= control target key end

     0   :  { %s1084_s21 = smov 0   ;;  %s1086_s22 = smov 0   ;;  %s1244_s0 = inlined_call_operand.vmem [shape: f32[2,4,256], index: 0, kind: input, shape index: {}, may-alias: {0,1}]   ;;  %s1245_s1 = inlined_call_operand.vmem [shape: f32[2,4,256], index: 1, kind: input, shape index: {}, may-alias: {0,1}]   ;;  %s1246_s2 = inlined_call_operand.vmem [shape: bf16[8,144], index: 2, kind: input, shape index: {}]   ;;  %s1247_s3 = inlined_call_operand.vmem [shape: f32[8,1], index: 3, kind: input, shape index: {}]   ;;  %s1248_s4 = inlined_call_operand.vmem [shape: f32[3,128], index: 4, kind: input, shape index: {}]   ;;  %s1249_s5 = inlined_call_operand.vmem [shape: bf16[2,8,256], index: 5, kind: output, shape index: {0}]   ;;  %s1250_s6 = inlined_call_operand.vmem [shape: f32[2,8,128], index: 6, kind: output, shape index: {1}]  }
   0x1   :  { %s1088_s23 = smov 0   ;;  %s1090_s24 = smov 0  }
   0x2   :  { %s1092_s25 = smov 0  }
   0x3 LB: > { %s26_s26 = sadd.s32 1, %s1028_s23  ;;  %s29_s27 = sadd.s32 1, %s1032_s24  ;;  %s1036_s25 = sphi %s1092_s25, %s17_s25   ;;  %s1032_s24 = sphi %s1090_s24, %s1254_s24   ;;  %s1028_s23 = sphi %s1088_s23, %s1253_s23   ;;  %s1024_s22 = sphi %s1086_s22, %s1252_s22   ;;  %s1020_s21 = sphi %s1084_s21, %s1251_s21  }
   0x4   : > { %p27_p0 = scmp.ge.s32.totalorder %s26_s26, 2  ;;  %p890_p1 = scmp.ge.s32.totalorder %s1036_s25, 1 }
   0x5   : > { %p261_p2 = scmp.lt.s32.totalorder %s1036_s25, 5 }
   0x6   : > { %s1256_s26 = smov (%p27_p0, %s26_s26), 0  ;;  %s1258_s27 = smov (!%p27_p0, %s29_s27), %s1032_s24 }
   0x7   : > { %p262_p3 = pnand %p890_p1, %p261_p2  ;;  %p31_p4 = scmp.ge.s32.totalorder %s1258_s27, 2 }
   0x8   : > { %p312_p5 = scmp.lt.s32.totalorder (!%p262_p3), %s1024_s22, 1  ;;  %p314_p6 = scmp.lt.s32.totalorder (!%p262_p3), %s1020_s21, 1 }
   0x9   : > { %s1260_s27 = smov (%p31_p4, %s1258_s27), 0  ;;  %265 = sbr.rel (%p262_p3) target bundleno = 655 (0x28f), region = 40 }
   0xa   : > { %s320_s28 = sadd.s32 (!%p262_p3), 1, %s1020_s21  ;;  %p347_p7 = scmp.eq.s32.totalorder (!%p262_p3), %s1020_s21, 0 }
   0xb   : > { %p321_p8 = scmp.lt.s32.totalorder (!%p262_p3), %s320_s28, 1  ;;  %p901_p9 = scmp.ne.s32.totalorder (!%p262_p3), %s1020_s21, 0 }
   0xe   : > { %s1262_s22 = smov (!%p312_p5, %s1024_s22), 1  ;;  %s1264_s28 = smov (!%p321_p8, %s320_s28), 1 }
   0xf   : > { %s315_s29 = scalar_select %p314_p6, %s1020_s21, 1 }
  0x10   : > { %s891_s30 = sshll.u32 %s1262_s22, 1  ;;  %s900_s8 = sshll.u32 %s1262_s22, 3 }
  0x11   : > { %s317_s7 = sadd.s32 %s891_s30, %s315_s29  ;;  %s1123_s12 = scalar_lea.vmem %s1250_s6, %s900_s8 }
  0x12   : > { %s892_s9 = sshll.u32 %s317_s7, 2  ;;  %s1266_s28 = smov (!%p321_p8, %s1264_s28), 1 }
  0x13   : > { %s319_s15 = scalar_lea.vmem %s1244_s0, %s892_s9  ;;  %s1131_s18 = scalar_lea.vmem %s1249_s5, %s892_s9 }
  0x14   : > { %s328_s19 = sadd.s32 %s891_s30, %s1266_s28  ;;  %350 = sbr.rel (%p901_p9) target bundleno = 27 (0x1b), region = 44 }
  0x15   : > { %s897_s20 = sshll.u32 %s328_s19, 2 }
  0x16   : > { %s330_s7 = scalar_lea.vmem %s1245_s1, %s897_s20 }
  0x19   : > { %v1038_v0 = vmov 0.0  }
  0x1a   : > { %351 = vst [vmem:[%s1123_s12] sm:$0xff] %v1038_v0 }
  0x1b PF: > { %v902_v1 = vld [vmem:[%s1248_s4] ss:$0 sm:$0xff]  ;;  %s1039_s9 = smov 15   ;;  %v905_v2 = vld [vmem:[%s1248_s4 + $0x2] ss:$0 sm:$0xff]  ;;  %p365_p10 = scmp.eq.s32.totalorder %s1020_s21, 1 }
  0x1c   : > { %534 = vrot.lane.b32.xlu0 %v902_v1, %s1039_s9  ;;  %s357_s11 = scalar_select %p347_p7, 1, 0  ;;  %v356_v3 = vld [vmem:[#allocation4] sm:$0xf]  ;;  %v352_v4 = vld [vmem:[%s319_s15] sm:$0xf] }
  0x1d   : > { %v361_v5 = vld [vmem:[%s330_s7] sm:$0xf]  ;;  %vm353_vm0 = vcmp.ge.f32.partialorder %v352_v4, 0.0  ;;  %v354_v7 = vmul.f32 0.2, %v352_v4  ;;  %s1040_s13 = smov 1  }
  0x1e   : > { %v358_v6 = vstv %s357_s11  ;;  %vm362_vm2 = vcmp.ge.f32.partialorder %v361_v5, 0.0  ;;  %v363_v8 = vmul.f32 0.2, %v361_v5  ;;  %s1041_s14 = smov 112   ;;  %vm370_vm3 = vcmask 913272   ;;  %s1043_s15 = smov 113  }
  0x1f   : > { %vm359_vm1 = vcmp.eq.s32.totalorder %v358_v6, 1  ;;  %v1149_v10 = vsel %vm353_vm0, %v352_v4, %v354_v7  ;;  %s366_s16 = scalar_select %p365_p10, 1, 0  ;;  %v1042_v12 = vmov 0.0   ;;  %vm379_vm4 = vcmask 125952  }
  0x20   : > { %507 = vrot.lane.b32.xlu0 %v905_v2, %s1040_s13  ;;  %v360_v9 = vsel %vm359_vm1, 0.0, %v356_v3  ;;  %378 = vst [vmem:[#allocation2 + $0x4] sm:$0xf] %v1149_v10  ;;  %v364_v11 = vsel %vm362_vm2, %v361_v5, %v363_v8  ;;  %371 = vst.msk [vmem:[#allocation2] sm:$0xf] %vm370_vm3, %v1042_v12  ;;  %vm381_vm6 = vcmask 134272  }
  0x21   : > { %373 = vrot.lane.b32.xlu1 %v360_v9, %s1041_s14  ;;  %v367_v13 = vstv %s366_s16  ;;  %s1044_s21 = smov 127   ;;  %s1045_s17 = smov 17   ;;  %v1047_v18 = vmov 0   ;;  %vm468_vm7 = vcmask 121856   ;;  %vm495_vm8 = vcmask 7168  }
  0x22   : > { %vm368_vm5 = vcmp.eq.s32.totalorder %v367_v13, 1  ;;  %s1046_s19 = smov 111   ;;  %690 = vmatprep.subr.bf16.mxu0 %v1047_v18  ;;  %420 = vst [vmem:[#allocation3] sm:$0xc] %v1047_v18  ;;  %421 = vst [vmem:[#allocation3 + $0x4] sm:$0xf] %v1047_v18  ;;  %985 = vset.pattern.permute.xlu0 %v1047_v18 }
  0x23   : > { %v369_v14 = vsel %vm368_vm5, 0.0, %v364_v11  ;;  %440 = vst [vmem:[#allocation3 + $0x8] sm:$0xc] %v1047_v18  ;;  %441 = vst [vmem:[#allocation3 + $0xc] sm:$0xf] %v1047_v18  ;;  %vm376_vm9 = vcmask 1044352  }
  0x24   : > { %448 = vrot.lane.b32.xlu0 %v905_v2, %s1043_s15  ;;  %380 = vst.msk [vmem:[#allocation2 + $0x8] sm:$0xf] %vm379_vm4, %v369_v14  ;;  %472 = vst [vmem:[#allocation3 + $0x10] sm:$0xc] %v1047_v18  ;;  %vm451_vm10 = vcmask 924672   ;;  %vm478_vm11 = vcmask 1039360  }
  0x25   : > { %475 = vrot.lane.b32.xlu1 %v902_v1, %s1044_s21  ;;  %382 = vst.msk [vmem:[#allocation2 + $0x8] sm:$0xf] %vm381_vm6, %v1042_v12  ;;  %473 = vst [vmem:[#allocation3 + $0x14] sm:$0xf] %v1047_v18  ;;  %vm416_vm12 = vcmask 138240   ;;  %vm399_vm13 = vcmask 908288  }
  0x26   : > { %499 = vst [vmem:[#allocation3 + $0x18] sm:$0xc] %v1047_v18  ;;  %500 = vst [vmem:[#allocation3 + $0x1c] sm:$0xf] %v1047_v18  ;;  %vm574_vm14 = vcmask 916480   ;;  %s1048_s20 = smov 16  }
  0x27   : > { %504 = vst [vmem:[#allocation3 + $0x20] sm:$0xc] %v1047_v18  ;;  %505 = vst [vmem:[#allocation3 + $0x24] sm:$0xf] %v1047_v18  ;;  %v501_v27 = vld [vmem:[#allocation2 + $0x4] sm:$0xf] }
  0x28   : > { %581 = vrot.lane.b32.xlu0 %v905_v2, %s1045_s17  ;;  %531 = vst [vmem:[#allocation3 + $0x28] sm:$0xc] %v1047_v18  ;;  %532 = vst [vmem:[#allocation3 + $0x2c] sm:$0xf] %v1047_v18  ;;  %v502_v29 = vpack.c.bf16 %v501_v27, %v501_v27  ;;  %vm436_vm15 = vcmask 130048   ;;  %vm740_vm0 = vcmask 15368  }
  0x29   : > { %396 = vrot.lane.b32.xlu1 %v902_v1, %s1046_s19  ;;  %558 = vst [vmem:[#allocation3 + $0x30] sm:$0xc] %v1047_v18  ;;  %559 = vst [vmem:[#allocation3 + $0x34] sm:$0xf] %v1047_v18  ;;  %v607_v1 = vld [vmem:[%s1246_s2] sm:$0xff] }
  0x2a   : > { %578 = vst [vmem:[#allocation3 + $0x38] sm:$0xc] %v1047_v18  ;;  %579 = vst [vmem:[#allocation3 + $0x3c] sm:$0xf] %v1047_v18  ;;  %v913_v2 = vcombine.high %v607_v1, %v607_v1 }
  0x2b   : > { %605 = vst [vmem:[#allocation3 + $0x40] sm:$0xc] %v1047_v18  ;;  %606 = vst [vmem:[#allocation3 + $0x44] sm:$0xf] %v1047_v18 }
  0x2c   : > { %v1157_v15 = vld [vmem:[#allocation2 + $0x4] sm:$0xff]  ;;  %503 = vst [vmem:[#allocation3 + $0x20] sm:$0x3] %v502_v29  ;;  %923 = vmatprep.mubr.msk.bf16.mxu0 %vm436_vm15, %v913_v2 }
  0x2d   : > { %v562_v16 = vcombine.high %v1157_v15, %v1157_v15 }
  0x2f   : > { %v932_v17 = vpack.c.bf16 %v562_v16, %v1157_v15 }
  0x31   : > { %571 = vrot.lane.b32.xlu1 %v932_v17, %s1041_s14 }
  0x8e   : > { %v535_v19 = vpop.permute.xlu0 %534 }
  0x8f   : > { %v536_v20 = vrot.slane %v535_v19, 4 }
  0x91   : > { %v538_v21 = vsel %vm468_vm7, %v536_v20, %v535_v19 }
  0x92   : > { %v540_v22 = vmul.f32 %v538_v21, %v1157_v15  ;;  %v508_v23 = vpop.permute.xlu0 %507 }
  0x93   : > { %v509_v24 = vrot.slane %v508_v23, 4  ;;  %v374_v25 = vpop.permute.xlu1 %373 }
  0x94   : > { %v542_v26 = vcombine.high %v540_v22, %v540_v22  ;;  %377 = vst.msk [vmem:[#allocation2] sm:$0xf] %vm376_vm9, %v374_v25  ;;  %v990_v25 = vld [vmem:[#allocation3 + $0x20] sm:$0xff]  }
  0x95   : > { %v511_v28 = vsel %vm495_vm8, %v509_v24, %v508_v23 }
  0x96   : > { %v513_v30 = vmul.f32 %v1157_v15, %v511_v28  ;;  %v449_v31 = vpop.permute.xlu0 %448  ;;  %v931_v32 = vpack.c.bf16 %v542_v26, %v540_v22 }
  0x97   : > { %v476_v33 = vpop.permute.xlu1 %475  ;;  %v450_v34 = vrot.slane %v449_v31, 4 }
  0x98   : > { %v515_v35 = vcombine.high %v513_v30, %v513_v30  ;;  %v477_v36 = vrot.slane %v476_v33, 4  ;;  %551 = vrot.lane.b32.xlu0 %v931_v32, %s1043_s15 }
  0x99   : > { %v452_v37 = vsel %vm451_vm10, %v450_v34, %v449_v31  ;;  %v912_v34 = vcombine.low %v607_v1, %v607_v1 }
  0x9a   : > { %v479_v38 = vsel %vm478_vm11, %v477_v36, %v476_v33  ;;  %v930_v39 = vpack.c.bf16 %v515_v35, %v513_v30  ;;  %v582_v40 = vpop.permute.xlu0 %581 }
  0x9b   : > { %v474_v41 = vld [vmem:[#allocation2] sm:$0xff]  ;;  %v397_v42 = vpop.permute.xlu1 %396  ;;  %v583_v43 = vrot.slane %v582_v40, 4 }
  0x9c   : > { %v481_v44 = vmul.f32 %v479_v38, %v474_v41  ;;  %v454_v45 = vmul.f32 %v474_v41, %v452_v37  ;;  %v398_v46 = vrot.slane %v397_v42, 4  ;;  %524 = vrot.lane.b32.xlu1 %v930_v39, %s1044_s21  ;;  %v424_v55 = vcombine.high %v474_v41, %v474_v41 }
  0x9d   : > { %v585_v47 = vsel %vm416_vm12, %v583_v43, %v582_v40  ;;  %v730_v40 = vld [vmem:[%s1123_s12] sm:$0xff] }
  0x9e   : > { %v483_v48 = vcombine.high %v481_v44, %v481_v44  ;;  %v456_v49 = vcombine.high %v454_v45, %v454_v45  ;;  %v400_v50 = vsel %vm399_vm13, %v398_v46, %v397_v42  ;;  %v587_v51 = vmul.f32 %v585_v47, %v1157_v15 }
  0x9f   : > { %v402_v52 = vmul.f32 %v474_v41, %v400_v50  ;;  %v927_v59 = vpack.c.bf16 %v424_v55, %v474_v41 }
  0xa0   : > { %v929_v53 = vpack.c.bf16 %v483_v48, %v481_v44  ;;  %v928_v54 = vpack.c.bf16 %v456_v49, %v454_v45  ;;  %v589_v57 = vcombine.high %v587_v51, %v587_v51 }
  0xa1   : > { %v404_v56 = vcombine.high %v402_v52, %v402_v52 }
  0xa2   : > { %492 = vrot.lane.b32.xlu0 %v929_v53, %s1040_s13  ;;  %465 = vrot.lane.b32.xlu1 %v928_v54, %s1039_s9  ;;  %v933_v61 = vpack.c.bf16 %v589_v57, %v587_v51 }
  0xa3   : > { %v926_v58 = vpack.c.bf16 %v404_v56, %v402_v52  ;;  %v572_v60 = vpop.permute.xlu1 %571 }
  0xa4   : > { %v573_v62 = vrot.slane %v572_v60, 4 }
  0xa6   : > { %433 = vrot.lane.b32.xlu0 %v927_v59, %s1048_s20  ;;  %413 = vrot.lane.b32.xlu1 %v926_v58, %s1045_s17  ;;  %v575_v63 = vsel %vm574_vm14, %v572_v60, %v573_v62 }
  0xa7   : > { %577 = vst [vmem:[#allocation3 + $0x38] sm:$0x3] %v575_v63 }
  0xaa   : > { %598 = vrot.lane.b32.xlu0 %v933_v61, %s1046_s19 }
  0xae   : > { %v987_v0 = vld [vmem:[#allocation3 + $0x38] sm:$0xff]  }
  0xaf   : > { %691 = vmatpush1.bf16.msra.mxu0 %v987_v0 }
  0xb0   : > { %692 = vmatprep.subr.bf16.mxu0 %v1047_v18 }
 0x10a   : > { %v552_v3 = vpop.permute.xlu0 %551 }
 0x10b   : > { %v553_v4 = vrot.slane %v552_v3, 4 }
 0x10d   : > { %v555_v5 = vsel %vm451_vm10, %v552_v3, %v553_v4 }
 0x10e   : > { %557 = vst [vmem:[#allocation3 + $0x30] sm:$0x3] %v555_v5  ;;  %v525_v6 = vpop.permute.xlu1 %524 }
 0x10f   : > { %v526_v7 = vrot.slane %v525_v6, 4 }
 0x111   : > { %v528_v8 = vsel %vm478_vm11, %v525_v6, %v526_v7 }
 0x112   : > { %530 = vst [vmem:[#allocation3 + $0x28] sm:$0x3] %v528_v8 }
 0x114   : > { %v493_v9 = vpop.permute.xlu0 %492  ;;  %v466_v11 = vpop.permute.xlu1 %465 }
 0x115   : > { %v494_v12 = vrot.slane %v493_v9, 4  ;;  %v467_v13 = vrot.slane %v466_v11, 4  ;;  %v988_v14 = vld [vmem:[#allocation3 + $0x30] sm:$0xff]  }
 0x116   : > { %693 = vmatpush1.bf16.msra.mxu0 %v988_v14 }
 0x117   : > { %v496_v15 = vsel %vm495_vm8, %v493_v9, %v494_v12  ;;  %v469_v16 = vsel %vm468_vm7, %v466_v11, %v467_v13  ;;  %694 = vmatprep.subr.bf16.mxu0 %v1047_v18 }
 0x118   : > { %498 = vst [vmem:[#allocation3 + $0x18] sm:$0x3] %v496_v15  ;;  %471 = vst [vmem:[#allocation3 + $0x10] sm:$0x3] %v469_v16  ;;  %v434_v17 = vpop.permute.xlu0 %433  ;;  %v414_v19 = vpop.permute.xlu1 %413 }
 0x119   : > { %v435_v20 = vrot.slane %v434_v17, 4  ;;  %v415_v21 = vrot.slane %v414_v19, 4  ;;  %v989_v22 = vld [vmem:[#allocation3 + $0x28] sm:$0xff]  }
 0x11a   : > { %695 = vmatpush1.bf16.msra.mxu0 %v989_v22 }
 0x11b   : > { %v437_v23 = vsel %vm436_vm15, %v434_v17, %v435_v20  ;;  %v417_v24 = vsel %vm416_vm12, %v414_v19, %v415_v21  ;;  %696 = vmatprep.subr.bf16.mxu0 %v1047_v18 }
 0x11c   : > { %439 = vst [vmem:[#allocation3 + $0x8] sm:$0x3] %v437_v23  ;;  %419 = vst [vmem:[#allocation3] sm:$0x3] %v417_v24  ;;  %v599_v26 = vpop.permute.xlu0 %598 }
 0x11d   : > { %v600_v27 = vrot.slane %v599_v26, 4 }
 0x11e   : > { %697 = vmatpush1.bf16.msra.mxu0 %v990_v25 }
 0x11f   : > { %v602_v28 = vsel %vm399_vm13, %v599_v26, %v600_v27  ;;  %698 = vmatprep.subr.bf16.mxu0 %v1047_v18  ;;  %v991_v29 = vld [vmem:[#allocation3 + $0x18] sm:$0xff]   ;;  %v992_v30 = vld [vmem:[#allocation3 + $0x10] sm:$0xff]  }
 0x120   : > { %604 = vst [vmem:[#allocation3 + $0x40] sm:$0x3] %v602_v28 }
 0x122   : > { %699 = vmatpush1.bf16.msra.mxu0 %v991_v29 }
 0x123   : > { %700 = vmatprep.subr.bf16.mxu0 %v1047_v18  ;;  %v993_v31 = vld [vmem:[#allocation3 + $0x8] sm:$0xff]   ;;  %v994_v32 = vld [vmem:[#allocation3] sm:$0xff]  }
 0x126   : > { %701 = vmatpush1.bf16.msra.mxu0 %v992_v30 }
 0x127   : > { %702 = vmatprep.subr.bf16.mxu0 %v1047_v18  ;;  %v995_v33 = vld [vmem:[#allocation3 + $0x40] sm:$0xff]  }
 0x12a   : > { %703 = vmatpush1.bf16.msra.mxu0 %v993_v31 }
 0x12b   : > { %704 = vmatprep.subr.bf16.mxu0 %v1047_v18 }
 0x12e   : > { %705 = vmatpush1.bf16.msra.mxu0 %v994_v32 }
 0x12f   : > { %720 = vmatprep.subr.bf16.mxu0 %v1047_v18  ;;  %v742_v18 = vld [vmem:[%s1247_s3] sm:$0xff] }
 0x132   : > { %721 = vmatpush2.bf16.msra.mxu0 %v995_v33 }
 0x135   : > { %723 = vmatmul.mubr.bf16.vlgmr.msra.gmra.mxu0 %v912_v34 }
 0x1f5   : > { %v724_v35 = vpop.f32.mrf.mxu0 }
 0x1f6   : > { %731 = vadd.xlane.f32.xlu1 %v724_v35  ;;  %v736_v36 = vmul.f32 %v724_v35, %v724_v35 }
 0x1f7   : > { %v726_v37 = vpop.f32.mrf.mxu0 }
 0x1f8   : > { %737 = vadd.xlane.f32.xlu0 %v736_v36 }
 0x1f9   : > { %v727_v38 = vpop.f32.mrf.mxu0 }
 0x1fb   : > { %v728_v39 = vpop.f32.mrf.mxu0 }
 0x207   : > { %384 = vrot.lane.b32.xlu1 %v1149_v10, %s1048_s20 }
 0x20e   : > { %745 = vperm.xlu0 %985, %v742_v18  }
 0x27f   : > { %v732_v41 = vpop.xlane.xlu1 %731 }
 0x280   : > { %v733_v42 = vadd.f32 %v732_v41, %v730_v40 }
 0x281   : > { %v738_v44 = vpop.xlane.xlu0 %737 }
 0x282   : > { %734 = vst.msk [vmem:[%s1123_s12] sm:$0xff] %vm495_vm8, %v733_v42 }
 0x283   : > { %v385_v43 = vpop.permute.xlu1 %384 }
 0x284   : > { %387 = vst.msk [vmem:[#allocation4] sm:$0xf] %vm379_vm4, %v385_v43 }
 0x289   : > { %v735_v45 = vld [vmem:[%s1123_s12] sm:$0xff]  ;;  %v746_v46 = vpop.permute.xlu0 %745 }
 0x28a   : > { %v739_v47 = vadd.f32 %v738_v44, %v735_v45  ;;  %v748_v10 = vadd.f32 %v746_v46, %v724_v35 }
 0x28c   : > { %741 = vst.msk [vmem:[%s1123_s12] sm:$0xff] %vm740_vm0, %v739_v47  ;;  %v749_v48 = vpack.c.bf16 %v748_v10, %v748_v10 }
 0x28e   : > { %750 = vst [vmem:[%s1131_s18] sm:$0xf] %v749_v48 }
 0x28f PF: > { %s17_s25 = sadd.s32 1, %s1036_s25   ;;  %s1251_s21 = smov %s1028_s23 }
 0x290   : > { %p14_p11 = scmp.ge.s32.totalorder %s17_s25, 6   ;;  %s1252_s22 = smov %s1032_s24 }
 0x291   : > { %s1253_s23 = smov %s1256_s26  ;;  %s1254_s24 = smov %s1260_s27 }
 0x292   :  { %16 = sbr.rel (!%p14_p11) target bundleno = 3 (0x3), region = 89 }

</bundles_post_ra>
